<compile_context>
chip_gen: v7x
topology: tpu7x:2x2x1
jax: 0.10.0
libtpu: 0.0.40
codegen_flags: <defaults>
</compile_context>

<pallas_src>
from functools import partial
from math import ceil

import jax
import jax.numpy as jnp
from jax import lax
from jax.experimental import pallas as pl
from jax.experimental.pallas import tpu as pltpu

LANE = 128


def _round_up(x, m):
    return ((x + m - 1) // m) * m


# ----------------------------------------------------------------------------
# Kernel
# ----------------------------------------------------------------------------
def _fvm_kernel(x_ref, w1_ref, b1_ref, w2t_ref, b2t_ref, out_ref):
    # x_ref   : [TB, D]     f32   (batch tile, unpadded feature dim)
    # w1_ref  : [D, Hcat]   bf16  (cols 0:hidden -> mean branch,
    #                              cols hidden:2*hidden -> kappa branch)
    # b1_ref  : [1, Hcat]   f32
    # w2t_ref : [8, Hcat]   bf16  transposed layer-2 (rows 0:3 mean, row 3 kappa;
    #                              block structure keeps branches independent)
    # b2t_ref : [8, 1]      f32
    # out_ref : [8, TB]     f32   rows 0:2 = normalized means, row 3 = kappa

    # Fused layer 1 for both branches: bf16 MXU matmul, f32 accumulation.
    x = x_ref[...].astype(jnp.bfloat16)
    h = jnp.dot(x, w1_ref[...], preferred_element_type=jnp.float32)
    h = jnp.maximum(h + b1_ref[...], 0.0)          # bias + ReLU in f32
    # dropout=None in the reference module -> identity

    # Fused layer 2, emitted directly outputs-major: out_t = W2^T @ h^T
    # (A @ B^T form -> native MXU trans_b path, no transposes materialized).
    out_t = lax.dot_general(
        w2t_ref[...], h.astype(jnp.bfloat16),
        dimension_numbers=(((1,), (1,)), ((), ())),
        preferred_element_type=jnp.float32) + b2t_ref[...]        # [8, TB]

    row = lax.broadcasted_iota(jnp.int32, out_t.shape, 0)
    is_mean = row < 3

    # torch.nn.functional.normalize(means, dim=-1): x / max(||x||_2, 1e-12)
    m = jnp.where(is_mean, out_t, 0.0)
    sumsq = jnp.sum(m * m, axis=0, keepdims=True)                 # [1, TB]
    inv = lax.rsqrt(jnp.maximum(sumsq, 1e-24))   # == 1/max(||m||, 1e-12); EUP
    means = m * inv

    kappas = jax.nn.sigmoid(out_t) * 20.0                         # EUP

    # Single lane-dense store of the whole [8, TB] slab (unmasked vst).
    out_ref[...] = jnp.where(is_mean, means, jnp.where(row == 3, kappas, 0.0))


# ----------------------------------------------------------------------------
# One-time wrapper-side weight fusion / packing (hoisted out of the forward)
# ----------------------------------------------------------------------------
def fuse_params(params, input_size):
    """Pack both branches into a single padded hidden group and transpose the
    (tiny) second layer so the kernel emits an outputs-major (8, B) slab.
    Padded columns/rows are zero, so padding cannot leak into the outputs."""
    hidden = ceil(input_size / 2)
    hcat = max(LANE, _round_up(2 * hidden, LANE))

    w1 = jnp.zeros((input_size, hcat), jnp.float32)
    w1 = w1.at[:, :hidden].set(params["w1_mean"])
    w1 = w1.at[:, hidden:2 * hidden].set(params["w1_kappa"])

    b1 = jnp.zeros((1, hcat), jnp.float32)
    b1 = b1.at[:, :hidden].set(params["b1_mean"])
    b1 = b1.at[:, hidden:2 * hidden].set(params["b1_kappa"])

    w2t = jnp.zeros((8, hcat), jnp.float32)
    w2t = w2t.at[0:3, :hidden].set(params["w2_mean"].T)
    w2t = w2t.at[3:4, hidden:2 * hidden].set(params["w2_kappa"].T)

    b2t = jnp.zeros((8, 1), jnp.float32)
    b2t = b2t.at[0:3, 0].set(params["b2_mean"][0])
    b2t = b2t.at[3, 0].set(params["b2_kappa"][0, 0])

    return {"w1": w1.astype(jnp.bfloat16), "b1": b1,
            "w2t": w2t.astype(jnp.bfloat16), "b2t": b2t}


def _vmem_need_bytes(tb, d, hcat):
    # Double-buffered pipeline tiles + (double-buffered) resident weights
    # + in-kernel temporaries, with 25% slack.
    dbuf = 2 * (tb * d * 4          # x tile (f32)
                + 8 * tb * 4        # out tile (f32)
                + d * hcat * 2      # W1 (bf16)
                + hcat * 4          # b1 (f32)
                + 8 * hcat * 2      # W2^T (bf16)
                + 8 * 4)            # b2^T (f32)
    work = tb * hcat * 6 + tb * d * 2   # h (f32 + bf16 copy), x bf16 copy
    return int((dbuf + work) * 1.25)


# ----------------------------------------------------------------------------
# Forward (steady-state path: just the pallas_call + 12 B/row output slice)
# ----------------------------------------------------------------------------
@partial(jax.jit, static_argnames=("tb",))
def fisher_von_mises_forward(x, fused, *, tb=1024):
    """x: [B, input_size] f32. Returns (means [B, 3] f32, kappas [B] f32)."""
    B, D = x.shape
    hcat = fused["w1"].shape[1]

    # Batch tile: multiple of 128 (lane-dense transposed output), >= 4 grid
    # steps when the batch allows it (v7x core-parallel), shrunk if the VMEM
    # estimate would overflow the tightest generation (v7x: 64 MiB / TC).
    tb_cap = _round_up(max((B + 3) // 4, 1), LANE)
    tb = max(LANE, min(_round_up(tb, LANE), tb_cap))
    while tb > LANE and _vmem_need_bytes(tb, D, hcat) > 48 * 2**20:
        tb -= LANE
    # For input_size so large that W1 alone overflows v7x VMEM, the contraction
    # would additionally need K-tiling (extra 'arbitrary' grid axis + f32
    # accumulator); not needed at the sizes this module is used with.
    vmem_limit = int(min(max(_vmem_need_bytes(tb, D, hcat), 32 * 2**20),
                         56 * 2**20))

    out_t = pl.pallas_call(
        _fvm_kernel,
        out_shape=jax.ShapeDtypeStruct((8, B), jnp.float32),
        grid_spec=pltpu.PrefetchScalarGridSpec(
            num_scalar_prefetch=0,
            grid=(pl.cdiv(B, tb),),
            in_specs=[
                pl.BlockSpec((tb, D), lambda i: (i, 0)),      # x tile (f32)
                pl.BlockSpec((D, hcat), lambda i: (0, 0)),    # W1cat (resident)
                pl.BlockSpec((1, hcat), lambda i: (0, 0)),    # b1cat (resident)
                pl.BlockSpec((8, hcat), lambda i: (0, 0)),    # W2^T  (resident)
                pl.BlockSpec((8, 1), lambda i: (0, 0)),       # b2^T  (resident)
            ],
            out_specs=pl.BlockSpec((8, tb), lambda i: (0, i)),
        ),
        compiler_params=pltpu.CompilerParams(
            dimension_semantics=("parallel",),   # v7x: shard batch over 2 TCs
            vmem_limit_bytes=vmem_limit,         # v5e default is only 16 MiB
        ),
    )(x, fused["w1"], fused["b1"], fused["w2t"], fused["b2t"])

    means = out_t[0:3, :].T      # [B, 3]
    kappas = out_t[3, :]         # [B]   (torch: kappas.squeeze(dim=-1))
    return means, kappas


# ----------------------------------------------------------------------------
# Parameter init (PyTorch-Linear-like uniform init) + references
# ----------------------------------------------------------------------------
def init_params(key, input_size):
    hidden_size = ceil(input_size / 2)
    keys = jax.random.split(key, 8)

    def lin(kw, kb, fan_in, fan_out):
        bound = 1.0 / jnp.sqrt(fan_in)
        w = jax.random.uniform(kw, (fan_in, fan_out), jnp.float32, -bound, bound)
        b = jax.random.uniform(kb, (1, fan_out), jnp.float32, -bound, bound)
        return w, b

    w1m, b1m = lin(keys[0], keys[1], input_size, hidden_size)
    w2m, b2m = lin(keys[2], keys[3], hidden_size, 3)
    w1k, b1k = lin(keys[4], keys[5], input_size, hidden_size)
    w2k, b2k = lin(keys[6], keys[7], hidden_size, 1)
    return {
        "w1_mean": w1m, "b1_mean": b1m, "w2_mean": w2m, "b2_mean": b2m,
        "w1_kappa": w1k, "b1_kappa": b1k, "w2_kappa": w2k, "b2_kappa": b2k,
    }


def reference_forward_f32(x, p):
    """Pure-f32 reference matching the PyTorch module semantics."""
    h_m = jnp.maximum(x @ p["w1_mean"] + p["b1_mean"], 0.0)
    m = h_m @ p["w2_mean"] + p["b2_mean"]
    m = m / jnp.maximum(jnp.linalg.norm(m, axis=-1, keepdims=True), 1e-12)
    h_k = jnp.maximum(x @ p["w1_kappa"] + p["b1_kappa"], 0.0)
    k = jax.nn.sigmoid(h_k @ p["w2_kappa"] + p["b2_kappa"]) * 20.0
    return m, k[:, 0]


def reference_forward_matched(x, fused):
    """Plain-JAX reference mirroring the kernel's fused bf16 MXU numerics."""
    h = jnp.dot(x.astype(jnp.bfloat16), fused["w1"],
                preferred_element_type=jnp.float32)
    h = jnp.maximum(h + fused["b1"], 0.0)
    out_t = lax.dot_general(
        fused["w2t"], h.astype(jnp.bfloat16),
        dimension_numbers=(((1,), (1,)), ((), ())),
        preferred_element_type=jnp.float32) + fused["b2t"]
    m = out_t[0:3]
    sumsq = jnp.sum(m * m, axis=0, keepdims=True)
    means = (m * lax.rsqrt(jnp.maximum(sumsq, 1e-24))).T
    kappas = jax.nn.sigmoid(out_t[3]) * 20.0
    return means, kappas


if __name__ == "__main__":
    key = jax.random.PRNGKey(0)
    k_x, k_p = jax.random.split(key)

    batch = 200              # tb clamps to 128 -> 2 grid steps, partial last block
    input_size = 32          # hidden = ceil(32/2) = 16 -> Hcat = 128 (packed)
    x = jax.random.normal(k_x, (batch, input_size), jnp.float32)
    params = init_params(k_p, input_size)
    fused = fuse_params(params, input_size)   # one-time layout plumbing

    means, kappas = jax.block_until_ready(fisher_von_mises_forward(x, fused))

    assert means.shape == (batch, 3) and kappas.shape == (batch,)

    # Tight check against a plain-JAX path using identical bf16 MXU operands.
    ref_m, ref_k = reference_forward_matched(x, fused)
    assert jnp.allclose(means, ref_m, atol=1e-3, rtol=1e-3)
    assert jnp.allclose(kappas, ref_k, atol=1e-3, rtol=1e-3)

    # Loose sanity check against the pure-f32 module semantics (bf16 rounding).
    f32_m, f32_k = reference_forward_f32(x, params)
    assert jnp.allclose(means, f32_m, atol=0.1, rtol=0.1)
    assert jnp.allclose(kappas, f32_k, atol=0.25, rtol=0.1)

    # Unit-norm check on means (F.normalize semantics).
    assert jnp.allclose(jnp.linalg.norm(means, axis=-1), 1.0, atol=1e-4)

    print("KERNEL_OK")
</pallas_src>

<mosaic_0001>
module attributes {stable_mosaic.version = 11 : i64} {
  func.func @_fvm_kernel(%arg0: i32, %arg1: memref<128x32xf32, #tpu.memory_space<vmem>>, %arg2: memref<32x128xbf16, #tpu.memory_space<vmem>>, %arg3: memref<1x128xf32, #tpu.memory_space<vmem>>, %arg4: memref<8x128xbf16, #tpu.memory_space<vmem>>, %arg5: memref<8x1xf32, #tpu.memory_space<vmem>>, %arg6: memref<8x128xf32, #tpu.memory_space<vmem>>) attributes {dimension_semantics = [#tpu.dimension_semantics<parallel>], iteration_bounds = array<i64: 2>, scalar_prefetch = 0 : i64, scratch_operands = 0 : i64, tpu.core_type = #tpu.core_type<tc>, window_params = [{transform_indices = @transform_0, window_bounds = array<i64: 128, 32>}, {pipeline_mode = #tpu.pipeline_mode<synchronous>, transform_indices = @transform_1, window_bounds = array<i64: 32, 128>}, {pipeline_mode = #tpu.pipeline_mode<synchronous>, transform_indices = @transform_2, window_bounds = array<i64: 1, 128>}, {pipeline_mode = #tpu.pipeline_mode<synchronous>, transform_indices = @transform_3, window_bounds = array<i64: 8, 128>}, {pipeline_mode = #tpu.pipeline_mode<synchronous>, transform_indices = @transform_4, window_bounds = array<i64: 8, 1>}, {transform_indices = @transform_5, window_bounds = array<i64: 8, 128>}]} {
    %c0 = arith.constant 0 : index
    %c0_0 = arith.constant 0 : index
    %0 = vector.load %arg1[%c0, %c0_0] : memref<128x32xf32, #tpu.memory_space<vmem>>, vector<128x32xf32>
    %1 = arith.truncf %0 : vector<128x32xf32> to vector<128x32xbf16>
    %c0_1 = arith.constant 0 : index
    %c0_2 = arith.constant 0 : index
    %2 = vector.load %arg2[%c0_1, %c0_2] : memref<32x128xbf16, #tpu.memory_space<vmem>>, vector<32x128xbf16>
    %cst = arith.constant dense<0.000000e+00> : vector<128x128xf32>
    %3 = tpu.matmul %1, %2, %cst {dimension_numbers = #tpu.dot_dimension_numbers<[1], [0], [0], [1], [0, 0, 1, 1], [], []>} : vector<128x32xbf16>, vector<32x128xbf16>, vector<128x128xf32> -> vector<128x128xf32>
    %c0_3 = arith.constant 0 : index
    %c0_4 = arith.constant 0 : index
    %4 = vector.load %arg3[%c0_3, %c0_4] : memref<1x128xf32, #tpu.memory_space<vmem>>, vector<1x128xf32>
    %5 = vector.broadcast %4 : vector<1x128xf32> to vector<128x128xf32>
    %6 = arith.addf %3, %5 : vector<128x128xf32>
    %cst_5 = arith.constant 0.000000e+00 : f32
    %7 = vector.broadcast %cst_5 : f32 to vector<128x128xf32>
    %8 = arith.maximumf %6, %7 : vector<128x128xf32>
    %c0_6 = arith.constant 0 : index
    %c0_7 = arith.constant 0 : index
    %9 = vector.load %arg4[%c0_6, %c0_7] : memref<8x128xbf16, #tpu.memory_space<vmem>>, vector<8x128xbf16>
    %10 = arith.truncf %8 : vector<128x128xf32> to vector<128x128xbf16>
    %cst_8 = arith.constant dense<0.000000e+00> : vector<8x128xf32>
    %11 = tpu.matmul %9, %10, %cst_8 {dimension_numbers = #tpu.dot_dimension_numbers<[1], [1], [0], [0], [0, 0, 1, 0], [], []>} : vector<8x128xbf16>, vector<128x128xbf16>, vector<8x128xf32> -> vector<8x128xf32>
    %c0_9 = arith.constant 0 : index
    %c0_10 = arith.constant 0 : index
    %12 = vector.load %arg5[%c0_9, %c0_10] : memref<8x1xf32, #tpu.memory_space<vmem>>, vector<8x1xf32>
    %13 = vector.broadcast %12 : vector<8x1xf32> to vector<8x128xf32>
    %14 = arith.addf %11, %13 : vector<8x128xf32>
    %15 = tpu.iota {dimensions = array<i32: 0>} : vector<8x128xi32>
    %c3_i32 = arith.constant 3 : i32
    %16 = vector.broadcast %c3_i32 : i32 to vector<8x128xi32>
    %17 = arith.cmpi slt, %15, %16 : vector<8x128xi32>
    %cst_11 = arith.constant 0.000000e+00 : f32
    %18 = vector.broadcast %cst_11 : f32 to vector<8x128xf32>
    %19 = arith.select %17, %14, %18 : vector<8x128xi1>, vector<8x128xf32>
    %20 = arith.mulf %19, %19 : vector<8x128xf32>
    %cst_12 = arith.constant dense<0.000000e+00> : vector<128xf32>
    %21 = vector.multi_reduction <add>, %20, %cst_12 [0] : vector<8x128xf32> to vector<128xf32>
    %22 = vector.shape_cast %21 : vector<128xf32> to vector<1x128xf32>
    %cst_13 = arith.constant 1.000000e-24 : f32
    %23 = vector.broadcast %cst_13 : f32 to vector<1x128xf32>
    %24 = arith.maximumf %22, %23 : vector<1x128xf32>
    %25 = math.rsqrt %24 : vector<1x128xf32>
    %26 = vector.broadcast %25 : vector<1x128xf32> to vector<8x128xf32>
    %27 = arith.mulf %19, %26 : vector<8x128xf32>
    %28 = arith.negf %14 : vector<8x128xf32>
    %29 = math.exp %28 : vector<8x128xf32>
    %cst_14 = arith.constant 1.000000e+00 : f32
    %30 = vector.broadcast %cst_14 : f32 to vector<8x128xf32>
    %31 = arith.addf %30, %29 : vector<8x128xf32>
    %32 = arith.divf %30, %31 : vector<8x128xf32>
    %cst_15 = arith.constant 2.000000e+01 : f32
    %33 = vector.broadcast %cst_15 : f32 to vector<8x128xf32>
    %34 = arith.mulf %32, %33 : vector<8x128xf32>
    %c3_i32_16 = arith.constant 3 : i32
    %35 = vector.broadcast %c3_i32_16 : i32 to vector<8x128xi32>
    %36 = arith.cmpi eq, %15, %35 : vector<8x128xi32>
    %cst_17 = arith.constant 0.000000e+00 : f32
    %37 = vector.broadcast %cst_17 : f32 to vector<8x128xf32>
    %38 = arith.select %36, %34, %37 : vector<8x128xi1>, vector<8x128xf32>
    %39 = arith.select %17, %27, %38 : vector<8x128xi1>, vector<8x128xf32>
    %c0_18 = arith.constant 0 : index
    %c0_19 = arith.constant 0 : index
    %40 = vector.load %arg6[%c0_18, %c0_19] : memref<8x128xf32, #tpu.memory_space<vmem>>, vector<8x128xf32>
    tpu.vector_store %arg6[%c0_18, %c0_19], %39 {strides = array<i32>} : memref<8x128xf32, #tpu.memory_space<vmem>>, vector<8x128xf32>,
    return
  }
  func.func @transform_0(%arg0: i32) -> (i32, i32) {
    %c0_i32 = arith.constant 0 : i32
    %c0_i32_0 = arith.constant 0 : i32
    return %arg0, %c0_i32 : i32, i32
  }
  func.func @transform_1(%arg0: i32) -> (i32, i32) {
    %c0_i32 = arith.constant 0 : i32
    %c0_i32_0 = arith.constant 0 : i32
    %c0_i32_1 = arith.constant 0 : i32
    return %c0_i32, %c0_i32_0 : i32, i32
  }
  func.func @transform_2(%arg0: i32) -> (i32, i32) {
    %c0_i32 = arith.constant 0 : i32
    %c0_i32_0 = arith.constant 0 : i32
    %c0_i32_1 = arith.constant 0 : i32
    return %c0_i32, %c0_i32_0 : i32, i32
  }
  func.func @transform_3(%arg0: i32) -> (i32, i32) {
    %c0_i32 = arith.constant 0 : i32
    %c0_i32_0 = arith.constant 0 : i32
    %c0_i32_1 = arith.constant 0 : i32
    return %c0_i32, %c0_i32_0 : i32, i32
  }
  func.func @transform_4(%arg0: i32) -> (i32, i32) {
    %c0_i32 = arith.constant 0 : i32
    %c0_i32_0 = arith.constant 0 : i32
    %c0_i32_1 = arith.constant 0 : i32
    return %c0_i32, %c0_i32_0 : i32, i32
  }
  func.func @transform_5(%arg0: i32) -> (i32, i32) {
    %c0_i32 = arith.constant 0 : i32
    %c0_i32_0 = arith.constant 0 : i32
    return %c0_i32, %arg0 : i32, i32
  }
}

</mosaic_0001>

<bundles_post_ra>
// kernel: fisher_von_mises_forward.1
= control target key start
LH: loop header
LB: loop body
LE: loop exit
PB: predicated region body
PF: predicated region fallthrough
CT: control target
= control target key end

     0   :  { %s706_s18 = smov 0   ;;  %s780_s0 = inlined_call_operand.vmem [shape: f32[200,32], index: 0, kind: input, shape index: {}]   ;;  %s781_s1 = inlined_call_operand.vmem [shape: bf16[32,128], index: 1, kind: input, shape index: {}]   ;;  %s782_s2 = inlined_call_operand.vmem [shape: f32[1,128], index: 2, kind: input, shape index: {}]   ;;  %s783_s3 = inlined_call_operand.vmem [shape: bf16[8,128], index: 3, kind: input, shape index: {}]   ;;  %s784_s4 = inlined_call_operand.vmem [shape: f32[8,1], index: 4, kind: input, shape index: {}]   ;;  %s785_s5 = inlined_call_operand.vmem [shape: f32[8,200], index: 5, kind: output, shape index: {}]  }
   0x1 LB: > { %s712_s19 = sadd.s32 4294967295, %s671_s18   ;;  %p568_p0 = scmp.ge.s32.totalorder %s671_s18, 1  ;;  %s671_s18 = sphi %s706_s18, %s15_s18  }
   0x2   : > { %p196_p1 = scmp.lt.s32.totalorder %s671_s18, 3 }
   0x4   : > { %p197_p2 = pnand %p568_p0, %p196_p1 }
   0x5   : > { %v657_v0 = vld [vmem:[%s781_s1] sm:$0xff] (!%p197_p2)   ;;  %s569_s22 = sshll.u32 (!%p197_p2), %s712_s19, 4  ;;  %v658_v1 = vld [vmem:[%s781_s1 + $0x8] sm:$0xff] (!%p197_p2)   ;;  %vm293_vm0 = vcmask (!%p197_p2), 261120   ;;  %v673_v26 = vmov (!%p197_p2), 0.0   ;;  %vm674_vm1 = vmmov (!%p197_p2), 0  }
   0x6   : > { %200 = sbr.rel (%p197_p2) target bundleno = 550 (0x226), region = 40  ;;  %p232_p3 = scmp.lt.s32.totalorder (!%p197_p2), %s569_s22, 24  ;;  %605 = vmatprep.subr.bf16.mxu0 (!%p197_p2), %v657_v0  ;;  %625 = vmatprep.subr.bf16.mxu1 (!%p197_p2), %v673_v26  ;;  %v440_v27 = vld [vmem:[%s784_s4] sm:$0xff] (!%p197_p2)  ;;  %v675_v28 = vmov (!%p197_p2), 0  }
   0x7   : > { %606 = vmatpush3.bf16.msra.mxu0 (!%p197_p2), %v657_v0  ;;  %641 = vmatprep.mubr.msk.bf16.mxu1 (!%p197_p2), %vm674_vm1, %v673_v26  ;;  %v572_v29 = vld [vmem:[%s782_s2] ss:$0 sm:$0xff] (!%p197_p2)  ;;  %p241_p4 = scmp.lt.s32.totalorder (!%p197_p2), %s712_s19, 1 }
   0x8   : > { %607 = vmatprep.subr.bf16.mxu0 (!%p197_p2), %v658_v1  ;;  %656 = vset.pattern.permute.xlu0 (!%p197_p2), %v675_v28 }
   0x9   : > { %443 = vperm.xlu0 (!%p197_p2), %656, %v440_v27  }
   0xb   : > { %608 = vmatpush3.bf16.msra.mxu0 (!%p197_p2), %v658_v1 }
   0xd   : > { %s787_s22 = smov (!%p232_p3, %s569_s22), 24  ;;  %s789_s19 = smov (!%p241_p4, %s712_s19), 1 }
   0xe   : > { %s570_s25 = sshll.u32 %s787_s22, 3  ;;  %s571_s10 = sshll.u32 %s789_s19, 3 }
   0xf   : > { %s726_s28 = scalar_lea.vmem %s780_s0, %s570_s25  ;;  %s244_s13 = scalar_lea.vmem %s785_s5, %s571_s10 }
  0x10   : > { %v246_v2 = vld [vmem:[%s726_s28] sm:$0xff]  ;;  %v247_v3 = vld [vmem:[%s726_s28 + $0x8] sm:$0xff]  ;;  %v248_v4 = vld [vmem:[%s726_s28 + $0x10] sm:$0xff] }
  0x11   : > { %v262_v5 = vpack.c.bf16 %v247_v3, %v246_v2  ;;  %v249_v6 = vld [vmem:[%s726_s28 + $0x18] sm:$0xff]  ;;  %v250_v7 = vld [vmem:[%s726_s28 + $0x20] sm:$0xff]  ;;  %v251_v8 = vld [vmem:[%s726_s28 + $0x28] sm:$0xff] }
  0x12   : > { %v263_v9 = vpack.c.bf16 %v249_v6, %v248_v4  ;;  %v264_v10 = vpack.c.bf16 %v251_v8, %v250_v7  ;;  %v252_v11 = vld [vmem:[%s726_s28 + $0x30] sm:$0xff]  ;;  %v253_v12 = vld [vmem:[%s726_s28 + $0x38] sm:$0xff]  ;;  %v254_v13 = vld [vmem:[%s726_s28 + $0x40] sm:$0xff] }
  0x13   : > { %609 = vmatprep.mubr.msk.bf16.mxu0 %vm293_vm0, %v262_v5  ;;  %v255_v14 = vld [vmem:[%s726_s28 + $0x48] sm:$0xff]  ;;  %v265_v15 = vpack.c.bf16 %v253_v12, %v252_v11  ;;  %v256_v17 = vld [vmem:[%s726_s28 + $0x50] sm:$0xff]  ;;  %v257_v18 = vld [vmem:[%s726_s28 + $0x58] sm:$0xff] }
  0x14   : > { %610 = vmatmul.mubr.msk.bf16.vlgmr.msra.gmra.mrb[0].mxu0 %vm293_vm0, %v263_v9  ;;  %v266_v16 = vpack.c.bf16 %v255_v14, %v254_v13  ;;  %v258_v19 = vld [vmem:[%s726_s28 + $0x60] sm:$0xff]  ;;  %v259_v20 = vld [vmem:[%s726_s28 + $0x68] sm:$0xff]  ;;  %v267_v21 = vpack.c.bf16 %v257_v18, %v256_v17  ;;  %v260_v23 = vld [vmem:[%s726_s28 + $0x70] sm:$0xff] }
  0x15   : > { %613 = vmatprep.mubr.msk.bf16.mxu0 %vm293_vm0, %v264_v10  ;;  %v268_v22 = vpack.c.bf16 %v259_v20, %v258_v19  ;;  %v261_v24 = vld [vmem:[%s726_s28 + $0x78] sm:$0xff] }
  0x16   : > { %v269_v25 = vpack.c.bf16 %v261_v24, %v260_v23  ;;  %v486_v23 = vlaneseq }
  0x18   : > { %v487_v24 = vshrl.u32 %v486_v23, 7 }
  0x1a   : > { %vm488_vm2 = vcmp.lt.s32.totalorder %v487_v24, 3  ;;  %vm507_vm3 = vcmp.eq.s32.totalorder %v487_v24, 3 }
  0x1c   : > { %614 = vmatmul.mubr.msk.bf16.gmra.mrb[4].mxu0 %vm293_vm0, %v265_v15 }
  0x1d   : > { %617 = vmatprep.mubr.msk.bf16.mxu0 %vm293_vm0, %v266_v16 }
  0x24   : > { %618 = vmatmul.mubr.msk.bf16.gmra.mrb[8].mxu0 %vm293_vm0, %v267_v21 }
  0x25   : > { %621 = vmatprep.mubr.msk.bf16.mxu0 %vm293_vm0, %v268_v22  ;;  %v431_v22 = vld [vmem:[%s783_s3] sm:$0xf] }
  0x2c   : > { %622 = vmatmul.mubr.msk.bf16.gmra.mrb[12].mxu0 %vm293_vm0, %v269_v25 }
  0x88   : > { %v444_v25 = vpop.permute.xlu0 %443 }
  0xe7   : > { %v611_v30 = vpop.f32.mrb[0].mxu0 }
  0xe8   : > { %v361_v31 = vadd.f32 %v611_v30, %v572_v29  ;;  %v352_v32 = vpop.f32.mrb[1].mxu0 }
  0xe9   : > { %v353_v33 = vadd.f32 %v572_v29, %v352_v32  ;;  %v612_v34 = vpop.f32.mrb[2].mxu0 }
  0xea   : > { %v364_v35 = vadd.f32 %v612_v34, %v572_v29  ;;  %v355_v36 = vpop.f32.mrb[3].mxu0  ;;  %v417_v38 = vmax.f32 %v361_v31, 0.0 }
  0xeb   : > { %v356_v37 = vadd.f32 %v572_v29, %v355_v36  ;;  %v415_v40 = vmax.f32 %v353_v33, 0.0 }
  0xec   : > { %v418_v39 = vmax.f32 %v364_v35, 0.0 }
  0xed   : > { %v416_v41 = vmax.f32 %v356_v37, 0.0 }
  0xee   : > { %v433_v42 = vpack.c.bf16 %v418_v39, %v417_v38 }
  0xef   : > { %v432_v43 = vpack.c.bf16 %v416_v41, %v415_v40  ;;  %v615_v44 = vpop.f32.mrb[4].mxu0 }
  0xf0   : > { %v377_v45 = vadd.f32 %v615_v44, %v572_v29  ;;  %v368_v46 = vpop.f32.mrb[5].mxu0 }
  0xf1   : > { %626 = vmatpush3.bf16.xpose.msra.mxu1 %v432_v43  ;;  %v369_v47 = vadd.f32 %v572_v29, %v368_v46  ;;  %v616_v48 = vpop.f32.mrb[6].mxu0 }
  0xf2   : > { %v421_v49 = vmax.f32 %v377_v45, 0.0  ;;  %v380_v50 = vadd.f32 %v616_v48, %v572_v29  ;;  %v371_v51 = vpop.f32.mrb[7].mxu0  ;;  %627 = vmatprep.subr.bf16.mxu1 %v673_v26 }
  0xf3   : > { %v419_v52 = vmax.f32 %v369_v47, 0.0  ;;  %v372_v53 = vadd.f32 %v572_v29, %v371_v51 }
  0xf4   : > { %v422_v54 = vmax.f32 %v380_v50, 0.0 }
  0xf5   : > { %v420_v55 = vmax.f32 %v372_v53, 0.0 }
  0xf6   : > { %v435_v56 = vpack.c.bf16 %v422_v54, %v421_v49 }
  0xf7   : > { %v434_v57 = vpack.c.bf16 %v420_v55, %v419_v52  ;;  %v619_v58 = vpop.f32.mrb[8].mxu0 }
  0xf8   : > { %v393_v59 = vadd.f32 %v619_v58, %v572_v29  ;;  %v384_v60 = vpop.f32.mrb[9].mxu0 }
  0xf9   : > { %628 = vmatpush3.bf16.xpose.msra.mxu1 %v433_v42  ;;  %v385_v61 = vadd.f32 %v572_v29, %v384_v60  ;;  %v620_v62 = vpop.f32.mrb[10].mxu0 }
  0xfa   : > { %629 = vmatprep.subr.bf16.mxu1 %v673_v26  ;;  %v425_v63 = vmax.f32 %v393_v59, 0.0  ;;  %v396_v0 = vadd.f32 %v620_v62, %v572_v29  ;;  %v387_v1 = vpop.f32.mrb[11].mxu0 }
  0xfb   : > { %v423_v2 = vmax.f32 %v385_v61, 0.0  ;;  %v388_v3 = vadd.f32 %v572_v29, %v387_v1 }
  0xfc   : > { %v426_v4 = vmax.f32 %v396_v0, 0.0 }
  0xfd   : > { %v424_v5 = vmax.f32 %v388_v3, 0.0 }
  0xfe   : > { %v437_v6 = vpack.c.bf16 %v426_v4, %v425_v63 }
  0xff   : > { %v436_v7 = vpack.c.bf16 %v424_v5, %v423_v2  ;;  %v623_v8 = vpop.f32.mrb[12].mxu0 }
 0x100   : > { %v409_v9 = vadd.f32 %v623_v8, %v572_v29  ;;  %v400_v10 = vpop.f32.mrb[13].mxu0 }
 0x101   : > { %630 = vmatpush3.bf16.xpose.msra.mxu1 %v434_v57  ;;  %v401_v11 = vadd.f32 %v572_v29, %v400_v10  ;;  %v624_v12 = vpop.f32.mrb[14].mxu0 }
 0x102   : > { %631 = vmatprep.subr.bf16.mxu1 %v673_v26  ;;  %v429_v13 = vmax.f32 %v409_v9, 0.0  ;;  %v412_v14 = vadd.f32 %v624_v12, %v572_v29  ;;  %v403_v15 = vpop.f32.mrb[15].mxu0 }
 0x103   : > { %v427_v16 = vmax.f32 %v401_v11, 0.0  ;;  %v404_v17 = vadd.f32 %v572_v29, %v403_v15 }
 0x104   : > { %v430_v18 = vmax.f32 %v412_v14, 0.0 }
 0x105   : > { %v428_v19 = vmax.f32 %v404_v17, 0.0 }
 0x106   : > { %v439_v20 = vpack.c.bf16 %v430_v18, %v429_v13 }
 0x107   : > { %v438_v21 = vpack.c.bf16 %v428_v19, %v427_v16 }
 0x109   : > { %632 = vmatpush3.bf16.xpose.msra.mxu1 %v435_v56 }
 0x10a   : > { %633 = vmatprep.subr.bf16.mxu1 %v673_v26 }
 0x111   : > { %634 = vmatpush3.bf16.xpose.msra.mxu1 %v436_v7 }
 0x112   : > { %635 = vmatprep.subr.bf16.mxu1 %v673_v26 }
 0x119   : > { %636 = vmatpush3.bf16.xpose.msra.mxu1 %v437_v6 }
 0x11a   : > { %637 = vmatprep.subr.bf16.mxu1 %v673_v26 }
 0x121   : > { %638 = vmatpush3.bf16.xpose.msra.mxu1 %v438_v21 }
 0x122   : > { %639 = vmatprep.subr.bf16.mxu1 %v673_v26 }
 0x129   : > { %640 = vmatpush3.bf16.xpose.msra.mxu1 %v439_v20 }
 0x130   : > { %642 = vmatmul.mubr.bf16.vlgmr.msra.gmra.mrb[0].mxu1 %v431_v22 }
 0x203   : > { %v480_v27 = vpop.f32.mrb[0].mxu1 }
 0x204   : > { %v481_v28 = vadd.f32 %v480_v27, %v444_v25  ;;  %v643_v29 = vpop.f32.mrb[1].mxu1 }
 0x205   : > { %v483_v30 = vpop.f32.mrb[2].mxu1 }
 0x206   : > { %v489_v31 = vsel %vm488_vm2, %v481_v28, 0.0  ;;  %v583_v32 = vmul.f32 -1.442695, %v481_v28  ;;  %v644_v26 = vpop.f32.mrb[3].mxu1 }
 0x207   : > { %v490_v33 = vmul.f32 %v489_v31, %v489_v31 }
 0x208   : > { %659 = vpow2.f32 %v583_v32 }
 0x209   : > { %v491_v34 = vrot.slane %v490_v33, 4 }
 0x20b   : > { %v492_v35 = vadd.f32 %v491_v34, %v490_v33 }
 0x20d   : > { %v493_v36 = vrot.slane %v492_v35, 2 }
 0x20f   : > { %v494_v37 = vadd.f32 %v493_v36, %v492_v35 }
 0x211   : > { %v495_v38 = vrot.slane %v494_v37, 1 }
 0x212   : > { %v660_v39 = vpop.eup %659 }
 0x213   : > { %v496_v40 = vadd.f32 %v495_v38, %v494_v37  ;;  %v503_v41 = vadd.f32 1.0, %v660_v39 }
 0x215   : > { %v497_v42 = vmax.f32 %v496_v40, 1e-24  ;;  %661 = vrcp.f32 %v503_v41 }
 0x217   : > { %663 = vrsqrt.f32 %v497_v42 }
 0x21f   : > { %v662_v43 = vpop.eup %661 }
 0x220   : > { %v506_v44 = vmul.f32 20.0, %v662_v43 }
 0x221   : > { %v664_v45 = vpop.eup %663 }
 0x222   : > { %v499_v46 = vmul.f32 %v664_v45, %v489_v31  ;;  %v508_v47 = vsel %vm507_vm3, %v506_v44, 0.0 }
 0x224   : > { %v509_v48 = vsel %vm488_vm2, %v499_v46, %v508_v47 }
 0x225   : > { %510 = vst [vmem:[%s244_s13] sm:$0xff] %v509_v48 }
 0x226 PF: > { %s15_s18 = sadd.s32 1, %s671_s18  }
 0x227   : > { %p12_p5 = scmp.ge.s32.totalorder %s15_s18, 4  }
 0x229   :  { %14 = sbr.rel (!%p12_p5) target bundleno = 1 (0x1), region = 70 }

</bundles_post_ra>
